<compile_context>
chip_gen: v6e
topology: v6e:2x2x1
jax: 0.10.0
libtpu: 0.0.40
codegen_flags: <defaults>
</compile_context>

<pallas_src>
import math
import functools

import jax
import jax.numpy as jnp
from jax.experimental import pallas as pl
from jax.experimental.pallas import tpu as pltpu


def _timestep_embed_kernel(t_ref, freqs_ref, out_ref, *, half_dim: int, dim: int):
    # t_ref:     (TB, 1)        float32 timesteps (tile of the batch)
    # freqs_ref: (1, half_dim)  float32 precomputed frequencies
    # out_ref:   (TB, dim)      float32 embeddings
    t = t_ref[...]                       # (TB, 1)
    args = t * freqs_ref[...]            # (TB, half_dim)  single lane-broadcast
    out_ref[:, :half_dim] = jnp.cos(args)
    out_ref[:, half_dim:2 * half_dim] = jnp.sin(args)
    if dim % 2 == 1:
        # Output blocks are not zero-initialized; must write the last column.
        out_ref[:, 2 * half_dim:] = jnp.zeros(
            (t.shape[0], dim - 2 * half_dim), dtype=jnp.float32)


def _round_up(x: int, m: int) -> int:
    return ((x + m - 1) // m) * m


def _choose_batch_tile(b: int, dim: int) -> int:
    # Target ~4 MiB per output tile so double-buffered in/out stays far below
    # the v7x 64 MiB physical / 32 MiB scoped VMEM, while still being big
    # enough (multiple of 8 sublanes, a few hundred rows) to hit the HBM
    # roofline on v5e/v6e.
    target_bytes = 4 * 1024 * 1024
    tb = target_bytes // max(dim * 4, 1)
    tb = max(8, min(1024, tb))
    tb = (tb // 8) * 8
    tb = min(tb, _round_up(b, 8))
    return max(tb, 8)


def timestep_embedding(timesteps: jax.Array, dim: int,
                       max_period: float = 10000.0) -> jax.Array:
    """Pallas equivalent of TimestepEmbedding.forward.

    Args:
      timesteps: (B,) array of timestep values (any real dtype).
      dim: embedding dimension.
    Returns:
      (B, dim) float32 embeddings.
    """
    assert timesteps.ndim == 1
    b = timesteps.shape[0]
    half_dim = dim // 2

    if half_dim == 0:
        # dim == 1: cos/sin halves are empty, result is a single zero column.
        return jnp.zeros((b, dim), dtype=jnp.float32)

    # Precompute freqs in the wrapper (hoisted out of the EUP-bound kernel).
    freqs = jnp.exp(
        (-math.log(float(max_period)) / float(half_dim))
        * jnp.arange(half_dim, dtype=jnp.float32)
    ).reshape(1, half_dim)

    tb = _choose_batch_tile(b, dim)
    padded_b = _round_up(b, tb)

    t2d = timesteps.astype(jnp.float32).reshape(b, 1)
    if padded_b != b:
        t2d = jnp.pad(t2d, ((0, padded_b - b), (0, 0)))

    kernel = functools.partial(
        _timestep_embed_kernel, half_dim=half_dim, dim=dim)

    out = pl.pallas_call(
        kernel,
        out_shape=jax.ShapeDtypeStruct((padded_b, dim), jnp.float32),
        grid=(padded_b // tb,),
        in_specs=[
            pl.BlockSpec((tb, 1), lambda i: (i, 0)),          # timesteps tile
            pl.BlockSpec((1, half_dim), lambda i: (0, 0)),    # shared freqs
        ],
        out_specs=pl.BlockSpec((tb, dim), lambda i: (i, 0)),
        compiler_params=pltpu.CompilerParams(
            dimension_semantics=("parallel",),
            vmem_limit_bytes=32 * 1024 * 1024,
        ),
    )(t2d, freqs)

    if padded_b != b:
        out = out[:b]
    return out


def _reference(timesteps: jax.Array, dim: int,
               max_period: float = 10000.0) -> jax.Array:
    half_dim = dim // 2
    freqs = jnp.exp(-math.log(max_period) *
                    jnp.arange(half_dim, dtype=jnp.float32) / half_dim)
    args = timesteps.astype(jnp.float32)[:, None] * freqs[None]
    emb = jnp.concatenate([jnp.cos(args), jnp.sin(args)], axis=-1)
    if dim % 2 == 1:
        emb = jnp.concatenate([emb, jnp.zeros_like(emb[:, :1])], axis=-1)
    return emb


if __name__ == "__main__":
    key = jax.random.PRNGKey(0)
    batch = 8
    dim = 64

    # Deterministic "timesteps" in [0, 1000), like diffusion step indices.
    timesteps = jax.random.uniform(key, (batch,), dtype=jnp.float32,
                                   minval=0.0, maxval=1000.0)

    out = timestep_embedding(timesteps, dim)
    out = jax.block_until_ready(out)

    ref = _reference(timesteps, dim)
    assert out.shape == (batch, dim)
    assert jnp.allclose(out, ref, atol=1e-5, rtol=1e-5), "mismatch vs reference"

    # Also exercise an odd dim + non-tile-aligned batch to cover those paths.
    out_odd = jax.block_until_ready(timestep_embedding(timesteps[:5], 33))
    ref_odd = _reference(timesteps[:5], 33)
    assert out_odd.shape == (5, 33)
    assert jnp.allclose(out_odd, ref_odd, atol=1e-5, rtol=1e-5), "odd-dim mismatch"

    print("KERNEL_OK")
</pallas_src>

<mosaic_0001>
module attributes {stable_mosaic.version = 11 : i64} {
  func.func @_timestep_embed_kernel(%arg0: i32, %arg1: memref<8x1xf32, #tpu.memory_space<vmem>>, %arg2: memref<1x32xf32, #tpu.memory_space<vmem>>, %arg3: memref<8x64xf32, #tpu.memory_space<vmem>>) attributes {dimension_semantics = [#tpu.dimension_semantics<parallel>], iteration_bounds = array<i64: 1>, scalar_prefetch = 0 : i64, scratch_operands = 0 : i64, tpu.core_type = #tpu.core_type<tc>, window_params = [{transform_indices = @transform_0, window_bounds = array<i64: 8, 1>}, {pipeline_mode = #tpu.pipeline_mode<synchronous>, transform_indices = @transform_1, window_bounds = array<i64: 1, 32>}, {transform_indices = @transform_2, window_bounds = array<i64: 8, 64>}]} {
    %c0 = arith.constant 0 : index
    %c0_0 = arith.constant 0 : index
    %0 = vector.load %arg1[%c0, %c0_0] : memref<8x1xf32, #tpu.memory_space<vmem>>, vector<8x1xf32>
    %c0_1 = arith.constant 0 : index
    %c0_2 = arith.constant 0 : index
    %1 = vector.load %arg2[%c0_1, %c0_2] : memref<1x32xf32, #tpu.memory_space<vmem>>, vector<1x32xf32>
    %2 = vector.broadcast %0 : vector<8x1xf32> to vector<8x32xf32>
    %3 = vector.broadcast %1 : vector<1x32xf32> to vector<8x32xf32>
    %4 = arith.mulf %2, %3 : vector<8x32xf32>
    %5 = math.cos %4 : vector<8x32xf32>
    %c0_3 = arith.constant 0 : index
    %c0_4 = arith.constant 0 : index
    %6 = vector.load %arg3[%c0_3, %c0_4] : memref<8x64xf32, #tpu.memory_space<vmem>>, vector<8x32xf32>
    tpu.vector_store %arg3[%c0_3, %c0_4], %5 {strides = array<i32>} : memref<8x64xf32, #tpu.memory_space<vmem>>, vector<8x32xf32>,
    %7 = math.sin %4 : vector<8x32xf32>
    %c0_5 = arith.constant 0 : index
    %c32 = arith.constant 32 : index
    %8 = vector.load %arg3[%c0_5, %c32] : memref<8x64xf32, #tpu.memory_space<vmem>>, vector<8x32xf32>
    tpu.vector_store %arg3[%c0_5, %c32], %7 {strides = array<i32>} : memref<8x64xf32, #tpu.memory_space<vmem>>, vector<8x32xf32>,
    return
  }
  func.func @transform_0(%arg0: i32) -> (i32, i32) {
    %c0_i32 = arith.constant 0 : i32
    %c0_i32_0 = arith.constant 0 : i32
    return %arg0, %c0_i32 : i32, i32
  }
  func.func @transform_1(%arg0: i32) -> (i32, i32) {
    %c0_i32 = arith.constant 0 : i32
    %c0_i32_0 = arith.constant 0 : i32
    %c0_i32_1 = arith.constant 0 : i32
    return %c0_i32, %c0_i32_0 : i32, i32
  }
  func.func @transform_2(%arg0: i32) -> (i32, i32) {
    %c0_i32 = arith.constant 0 : i32
    %c0_i32_0 = arith.constant 0 : i32
    return %arg0, %c0_i32 : i32, i32
  }
}

</mosaic_0001>

<bundles_post_ra>
// kernel: tpu_custom_call.1
= control target key start
LH: loop header
LB: loop body
LE: loop exit
PB: predicated region body
PF: predicated region fallthrough
CT: control target
= control target key end

     0   :  { %v304_v1 = vmov 0   ;;  %s359_s0 = inlined_call_operand.vmem [shape: f32[8,1], index: 0, kind: input, shape index: {}]   ;;  %s360_s1 = inlined_call_operand.vmem [shape: f32[1,32], index: 1, kind: input, shape index: {}]   ;;  %s361_s2 = inlined_call_operand.hbm [shape: f32[8,64], index: 2, kind: output, shape index: {}]  }
   0x1   :  { %v12_v0 = vld [vmem:[%s359_s0] sm:$0xff]  ;;  %277 = vset.pattern.permute.xlu0 %v304_v1 }
   0x2   :  { %16 = vperm.xlu0 %277, %v12_v0  }
   0x3   :  { %7 = vsyncpa [#allocation3], 0  ;;  %v255_v2 = vld [vmem:[%s360_s1] ss:$0 sm:$0xff]  ;;  %v305_v15 = vmov 683565275  }
   0x4   :  { %v306_v17 = vmov 2475754826   ;;  %v307_v20 = vmov 2131351028   ;;  %v308_v23 = vmov 2102212464  }
   0x5   :  { %v309_v26 = vmov 920167782   ;;  %v310_v29 = vmov 1326507024   ;;  %vm129_vm11 = vcmask 261120   ;;  %s311_s0 = smov 32  }
   0x6   :  { %s312_s1 = smov [#allocation2]  }
   0x7   :  { %s247_s13 = sshll.u32 %s312_s1, 4  ;;  %s248_s13 = int_to_ptr.vmem [resolvable:$true] %s247_s13 }
   0x8   :  { %s282_s14 = scalar_lea.vmem %s248_s13, 128  ;;  %p287_p1 = scmp.lt.s32.totalorder %s248_s13, %s248_s13 }
   0x9   :  { %p283_p0 = scmp.ne.s32.totalorder %s248_s13, %s282_s14  ;;  %p288_p2 = scmp.lt.s32.totalorder %s282_s14, %s282_s14 }
   0xb   :  { %p289_p3 = por %p288_p2, %p287_p1 }
   0xd   :  { %p290_p4 = pnand %p289_p3, %p283_p0 }
  0x7d   :  { %v17_v3 = vpop.permute.xlu0 %16 }
  0x7e   :  { %v334_v4 = vmul.f32 %v255_v2, %v17_v3 }
  0x80   :  { %v29_v5 = vand.u32 2139095040, %v334_v4  ;;  %v26_v9 = vand.u32 2147483647, %v334_v4  ;;  %vm28_vm7 = vcmp.lt.s32.totalorder %v334_v4, 0 }
  0x82   :  { %v30_v6 = vshrl.u32 %v29_v5, 23  ;;  %v33_v12 = vand.u32 8388607, %v26_v9  ;;  %vm27_vm8 = vcmp.le.f32.partialorder %v26_v9, 0.7853982 }
  0x84   :  { %v256_v7 = vadd.s32 4294967169, %v30_v6  ;;  %v34_v31 = vor.u32 8388608, %v33_v12 }
  0x86   :  { %v36_v8 = vadd.s32 1, %v256_v7  ;;  %v74_v45 = vshll.u32 %v34_v31, 8 }
  0x88   :  { %vm37_vm0 = vcmp.gt.s32.totalorder %v36_v8, 0 }
  0x89   :  { %v38_v10 = vsel %vm37_vm0, %v36_v8, 0  ;;  %vm118_vm0 = vweird.f32 %v334_v4 }
  0x8a   :  { %v40_v11 = vand.u32 31, %v38_v10  ;;  %v39_v14 = vshrl.u32 %v38_v10, 5 }
  0x8c   :  { %v41_v13 = vsub.s32 32, %v40_v11  ;;  %v43_v16 = vshll.u32 %v305_v15, %v40_v11  ;;  %v46_v18 = vshll.u32 %v306_v17, %v40_v11  ;;  %v49_v22 = vshll.u32 %v307_v20, %v40_v11 }
  0x8d   :  { %v52_v25 = vshll.u32 %v308_v23, %v40_v11  ;;  %v55_v28 = vshll.u32 %v309_v26, %v40_v11  ;;  %vm58_vm1 = vcmp.lt.s32.totalorder %v39_v14, 1  ;;  %vm61_vm2 = vcmp.lt.s32.totalorder %v39_v14, 4 }
  0x8e   :  { %v44_v19 = vshrl.u32 %v306_v17, %v41_v13  ;;  %v47_v21 = vshrl.u32 %v307_v20, %v41_v13  ;;  %v50_v24 = vshrl.u32 %v308_v23, %v41_v13  ;;  %v53_v27 = vshrl.u32 %v309_v26, %v41_v13 }
  0x8f   :  { %v56_v30 = vshrl.u32 %v310_v29, %v41_v13  ;;  %v42_v40 = vshrl.u32 %v305_v15, %v41_v13  ;;  %vm60_vm3 = vcmp.lt.s32.totalorder %v39_v14, 3  ;;  %vm59_vm4 = vcmp.lt.s32.totalorder %v39_v14, 2 }
  0x90   :  { %v45_v32 = vor.u32 %v44_v19, %v43_v16  ;;  %v48_v33 = vor.u32 %v47_v21, %v46_v18  ;;  %v51_v34 = vor.u32 %v50_v24, %v49_v22  ;;  %v54_v35 = vor.u32 %v53_v27, %v52_v25 }
  0x91   :  { %v57_v36 = vor.u32 %v56_v30, %v55_v28 }
  0x92   :  { %v63_v37 = vsel %vm61_vm2, %v51_v34, 2102212464  ;;  %v66_v38 = vsel %vm58_vm1, %v45_v32, %v48_v33  ;;  %v70_v39 = vsel %vm58_vm1, %v48_v33, %v51_v34  ;;  %v67_v41 = vsel %vm61_vm2, %v54_v35, 920167782 }
  0x93   :  { %v71_v42 = vsel %vm61_vm2, %v57_v36, 1326507024  ;;  %v68_v43 = vsel %vm60_vm3, %v51_v34, %v67_v41  ;;  %v62_v46 = vsel %vm58_vm1, %v42_v40, %v45_v32  ;;  %v64_v47 = vsel %vm60_vm3, %v48_v33, %v63_v37 }
  0x94   :  { %v72_v44 = vsel %vm60_vm3, %v54_v35, %v71_v42  ;;  %v69_v48 = vsel %vm59_vm4, %v66_v38, %v68_v43  ;;  %v65_v54 = vsel %vm59_vm4, %v62_v46, %v64_v47  ;;  %vm239_vm1 = vcmask 523520  }
  0x95   :  { %v73_v49 = vsel %vm59_vm4, %v70_v39, %v72_v44  ;;  %v343_v52 = vmul.u32.u64.low %v74_v45, %v69_v48  ;;  %v344_v53 = vmul.u32.u64.high %v74_v45, %v69_v48, %v343_v52  ;;  %v81_v56 = vmul.u32 %v74_v45, %v65_v54 }
  0x96   :  { %v340_v50 = vmul.u32.u64.low %v74_v45, %v73_v49  ;;  %v341_v51 = vmul.u32.u64.high %v74_v45, %v73_v49, %v340_v50 }
  0x97   :  { %v84_v55 = vadd.s32 1, %v344_v53 }
  0x98   :  { %vm83_vm5 = vc.u32 %v341_v51, %v343_v52  ;;  %v82_v5 = vadd.s32 %v343_v52, %v341_v51 }
  0x99   :  { %v85_v57 = vsel %vm83_vm5, %v84_v55, %v344_v53 }
  0x9a   :  { %v86_v58 = vadd.s32 %v85_v57, %v81_v56 }
  0x9c   :  { %v87_v59 = vadd.s32 536870912, %v86_v58 }
  0x9e   :  { %v88_v60 = vshrl.u32 %v87_v59, 30 }
  0xa0   :  { %v89_v61 = vshll.u32 %v88_v60, 30  ;;  %v112_v19 = vsub.s32 4, %v88_v60 }
  0xa2   :  { %v90_v62 = vsub.s32 %v86_v58, %v89_v61  ;;  %v113_v22 = vsel %vm28_vm7, %v112_v19, %v88_v60 }
  0xa3   :  { %v115_v23 = vsel %vm27_vm8, 0, %v113_v22 }
  0xa4   :  { %v92_v63 = vsub.s32 0, %v90_v62  ;;  %v224_v24 = vadd.s32 3, %v115_v23  ;;  %v119_v25 = vand.u32 3, %v115_v23 }
  0xa6   :  { %v257_v0 = vmin.u32 %v92_v63, %v90_v62  ;;  %v225_v26 = vand.u32 3, %v224_v24  ;;  %vm124_vm9 = vcmp.eq.s32.totalorder %v119_v25, 2  ;;  %vm121_vm12 = vcmp.eq.s32.totalorder %v119_v25, 0 }
  0xa7   :  { %vm120_vm14 = vcmp.lt.s32.totalorder %v119_v25, 2 }
  0xa8   :  { %v94_v1 = vclz %v257_v0  ;;  %vm230_vm10 = vcmp.eq.s32.totalorder %v225_v26, 2  ;;  %vm227_vm13 = vcmp.eq.s32.totalorder %v225_v26, 0  ;;  %vm226_vm15 = vcmp.lt.s32.totalorder %v225_v26, 2 }
  0xaa   :  { %v258_v2 = vadd.s32 4294967294, %v94_v1 }
  0xac   :  { %vm259_vm6 = vcmp.lt.s32.totalorder %v258_v2, 0 }
  0xad   :  { %v97_v3 = vsel %vm259_vm6, 0, %v258_v2 }
  0xae   :  { %v98_v6 = vsub.s32 32, %v97_v3  ;;  %v102_v7 = vsub.s32 4294967266, %v97_v3  ;;  %v99_v8 = vshll.u32 %v90_v62, %v97_v3 }
  0xb0   :  { %v100_v10 = vshrl.u32 %v82_v5, %v98_v6  ;;  %v103_v11 = vadd.s32 127, %v102_v7 }
  0xb2   :  { %v101_v12 = vor.u32 %v100_v10, %v99_v8  ;;  %v104_v13 = vshll.u32 %v103_v11, 23 }
  0xb4   :  { %v105_v14 = vor.u32 4788187, %v104_v13  ;;  %v108_v16 = vcvt.s32.f32 %v101_v12 }
  0xb6   :  { %v106_v15 = vand.u32 2147483647, %v105_v14 }
  0xb8   :  { %v109_v17 = vmul.f32 %v108_v16, %v106_v15 }
  0xba   :  { %v110_v18 = vxor.u32 2147483648, %v109_v17 }
  0xbc   :  { %v111_v20 = vsel %vm28_vm7, %v110_v18, %v109_v17 }
  0xbd   :  { %v114_v21 = vsel %vm27_vm8, %v334_v4, %v111_v20 }
  0xbe   :  { %278 = vcosq.f32 %v114_v21 }
  0xbf   :  { %280 = vsinq.f32 %v114_v21 }
  0xcb   :  { %v279_v27 = vpop.eup %278 }
  0xcc   :  { %v281_v28 = vpop.eup %280  ;;  %v125_v29 = vxor.u32 2147483648, %v279_v27 }
  0xcd   :  { %v122_v30 = vxor.u32 2147483648, %v281_v28 }
  0xce   :  { %v232_v31 = vsel %vm230_vm10, %v125_v29, %v281_v28  ;;  %v126_v9 = vsel %vm124_vm9, %v125_v29, %v281_v28 }
  0xcf   :  { %v229_v32 = vsel %vm227_vm13, %v279_v27, %v122_v30  ;;  %v123_v33 = vsel %vm121_vm12, %v279_v27, %v122_v30 }
  0xd0   :  { %v233_v34 = vsel %vm226_vm15, %v229_v32, %v232_v31  ;;  %v127_v35 = vsel %vm120_vm14, %v123_v33, %v126_v9 }
  0xd1   :  { %v234_v36 = vsel %vm118_vm0, nan, %v233_v34  ;;  %v128_v37 = vsel %vm118_vm0, nan, %v127_v35 }
  0xd2   :  { %236 = vrot.lane.b32.xlu0 %v234_v36, %s311_s0  ;;  %130 = vst.msk [vmem:[#allocation2] sm:$0xff] %vm129_vm11, %v128_v37 }
 0x144   :  { %v237_v38 = vpop.permute.xlu0 %236 }
 0x145   :  { %240 = vst.msk [vmem:[#allocation2] sm:$0xff] %vm239_vm1, %v237_v38 }
 0x146   :  { %293 = shalt.err (!%p290_p4)
}
 0x147   :  { %250 = dma.vmem_to_hbm [thread:$0]  %s248_s13, 128, %s361_s2, [#allocation3]  }
 0x148   :  { %302 = dma.done.wait [#allocation3], 128  }
 0x149   :  { %303 = vsyncadd [#allocation3], 4294967168 }
 0x14a   :  { %254 = vsyncpa [#allocation3], 1 }

</bundles_post_ra>
